<compile_context>
chip_gen: v6e
topology: v6e:2x2x1
jax: 0.10.0
libtpu: 0.0.40
codegen_flags: <defaults>
</compile_context>

<pallas_src>
import jax
import jax.numpy as jnp
from jax.experimental import pallas as pl
from jax.experimental.pallas import tpu as pltpu

IN_FEATURES = 3 * 2 * 4   # 24
OUT_FEATURES = 1
LANES = 128               # lane-dense padded width
SUBLANES = 8              # one full (8,128) f32 vreg tile

# Row layout of the packed slab
_ROW_X, _ROW_W, _ROW_OTHER = 0, 1, 2


def _linear_bcast_add_kernel(slab_ref, b_ref, o_ref):
    # slab_ref: (8, 128) VMEM  -- row 0: x_flat, row 1: weight, row 2: other
    #                             (columns >= 24 are zero)
    # b_ref:    (1, 1)   SMEM  -- Linear bias scalar
    # o_ref:    (1, 128) VMEM  -- lane-dense output; wrapper slices [:, :24]
    x = slab_ref[_ROW_X:_ROW_X + 1, :]          # (1, 128)
    w = slab_ref[_ROW_W:_ROW_W + 1, :]          # (1, 128)
    other = slab_ref[_ROW_OTHER:_ROW_OTHER + 1, :]  # (1, 128)

    # Dot product along the lane axis (zero padding contributes nothing),
    # plus scalar bias read from SMEM.  OUT_FEATURES == 1 so mul+reduce == x@W^T.
    v1 = jnp.sum(x * w, axis=1, keepdims=True) + b_ref[0, 0]   # (1, 1)

    # Broadcast (1,1) over (1,128) and add `other` (padded lanes discarded later).
    o_ref[...] = v1 + other


def model_forward(x1, weight, bias, other):
    # x1: (1, 3, 2, 4) float32  ->  flatten(start_dim=1) -> (1, 24)
    batch = x1.shape[0]
    x_flat = x1.reshape(batch, -1)                      # (1, 24)

    # Pack the three tiny operands into one lane-dense (8, 128) slab.
    slab = jnp.zeros((SUBLANES, LANES), dtype=jnp.float32)
    slab = slab.at[_ROW_X, :IN_FEATURES].set(x_flat[0])
    slab = slab.at[_ROW_W, :IN_FEATURES].set(weight[0])
    slab = slab.at[_ROW_OTHER, :IN_FEATURES].set(other[0])

    bias2d = bias.reshape(1, 1).astype(jnp.float32)     # SMEM scalar

    out_padded = pl.pallas_call(
        _linear_bcast_add_kernel,
        out_shape=jax.ShapeDtypeStruct((1, LANES), jnp.float32),
        in_specs=[
            pl.BlockSpec(memory_space=pltpu.VMEM),      # packed slab (8, 128)
            pl.BlockSpec(memory_space=pltpu.SMEM),      # bias (1, 1) scalar
        ],
        out_specs=pl.BlockSpec(memory_space=pltpu.VMEM),
    )(slab, bias2d)

    # Slice back to the module's true output shape (1, 24).
    return out_padded[:, :IN_FEATURES]


if __name__ == "__main__":
    key = jax.random.PRNGKey(0)
    k_x, k_w, k_b, k_o = jax.random.split(key, 4)

    # Deterministic synthetic parameters (shapes match nn.Linear(24, 1) + buffers)
    x1 = jax.random.normal(k_x, (1, 3, 2, 4), dtype=jnp.float32)
    weight = jax.random.normal(k_w, (OUT_FEATURES, IN_FEATURES), dtype=jnp.float32) * 0.1
    bias = jax.random.normal(k_b, (OUT_FEATURES,), dtype=jnp.float32) * 0.1
    other = jax.random.normal(k_o, (1, IN_FEATURES), dtype=jnp.float32)

    out = model_forward(x1, weight, bias, other)
    jax.block_until_ready(out)

    # Reference check in plain JAX
    ref = (x1.reshape(1, -1) @ weight.T + bias) + other
    assert out.shape == (1, IN_FEATURES), out.shape
    assert jnp.allclose(out, ref, atol=1e-5, rtol=1e-5), (out, ref)

    print("KERNEL_OK")
</pallas_src>

<mosaic_0001>
module attributes {stable_mosaic.version = 11 : i64} {
  func.func @_linear_bcast_add_kernel(%arg0: memref<8x128xf32, #tpu.memory_space<vmem>>, %arg1: memref<1x1xf32, #tpu.memory_space<smem>>, %arg2: memref<1x128xf32, #tpu.memory_space<vmem>>) attributes {dimension_semantics = [], scalar_prefetch = 0 : i64, scratch_operands = 0 : i64, tpu.core_type = #tpu.core_type<tc>} {
    %c0 = arith.constant 0 : index
    %c0_0 = arith.constant 0 : index
    %0 = vector.load %arg0[%c0, %c0_0] : memref<8x128xf32, #tpu.memory_space<vmem>>, vector<1x128xf32>
    %c1 = arith.constant 1 : index
    %c0_1 = arith.constant 0 : index
    %1 = vector.load %arg0[%c1, %c0_1] : memref<8x128xf32, #tpu.memory_space<vmem>>, vector<1x128xf32>
    %c2 = arith.constant 2 : index
    %c0_2 = arith.constant 0 : index
    %2 = vector.load %arg0[%c2, %c0_2] : memref<8x128xf32, #tpu.memory_space<vmem>>, vector<1x128xf32>
    %3 = arith.mulf %0, %1 : vector<1x128xf32>
    %cst = arith.constant dense<0.000000e+00> : vector<1xf32>
    %4 = vector.multi_reduction <add>, %3, %cst [1] : vector<1x128xf32> to vector<1xf32>
    %5 = vector.shape_cast %4 : vector<1xf32> to vector<1x1xf32>
    %c0_3 = arith.constant 0 : index
    %c0_4 = arith.constant 0 : index
    %6 = memref.load %arg1[%c0_3, %c0_4] : memref<1x1xf32, #tpu.memory_space<smem>>
    %7 = vector.broadcast %6 : f32 to vector<1x1xf32>
    %8 = arith.addf %5, %7 : vector<1x1xf32>
    %9 = vector.broadcast %8 : vector<1x1xf32> to vector<1x128xf32>
    %10 = arith.addf %9, %2 : vector<1x128xf32>
    %c0_5 = arith.constant 0 : index
    %c0_6 = arith.constant 0 : index
    %11 = vector.load %arg2[%c0_5, %c0_6] : memref<1x128xf32, #tpu.memory_space<vmem>>, vector<1x128xf32>
    tpu.vector_store %arg2[%c0_5, %c0_6], %10 {strides = array<i32>} : memref<1x128xf32, #tpu.memory_space<vmem>>, vector<1x128xf32>,
    return
  }
}

</mosaic_0001>

<bundles_post_ra>
// kernel: tpu_custom_call.1
= control target key start
LH: loop header
LB: loop body
LE: loop exit
PB: predicated region body
PF: predicated region fallthrough
CT: control target
= control target key end

     0   :  { %8 = vsyncpa [#allocation4], 0  ;;  %s125_s0 = inlined_call_operand.hbm [shape: f32[8,128], index: 0, kind: input, shape index: {}]   ;;  %s126_s1 = inlined_call_operand.<no memory space> [shape: f32[1,1], index: 1, kind: input, shape index: {}]   ;;  %s127_s2 = inlined_call_operand.hbm [shape: f32[1,128], index: 2, kind: output, shape index: {}]  }
   0x1   :  { %9 = vsyncpa [#allocation5], 0  ;;  %s99_s9 = smov [#allocation3]  }
   0x2   :  { %s16_s10 = sshll.u32 %s99_s9, 4  ;;  %s17_s10 = int_to_ptr.vmem [resolvable:$true] %s16_s10 }
   0x3   :  { %s63_s11 = scalar_lea.vmem %s17_s10, 128  ;;  %p68_p1 = scmp.lt.s32.totalorder %s17_s10, %s17_s10 }
   0x4   :  { %p64_p0 = scmp.ne.s32.totalorder %s17_s10, %s63_s11  ;;  %p69_p2 = scmp.lt.s32.totalorder %s63_s11, %s63_s11 }
   0x6   :  { %p70_p3 = por %p69_p2, %p68_p1 }
   0x8   :  { %p71_p4 = pnand %p70_p3, %p64_p0 }
   0xa   :  { %74 = shalt.err (!%p71_p4)
}
   0xb   :  { %19 = dma.hbm_to_vmem [thread:$0]  %s125_s0, 128, %s17_s10, [#allocation4]  }
   0xc   :  { %95 = dma.done.wait [#allocation4], 128  }
   0xd   :  { %96 = vsyncadd [#allocation4], 4294967168  ;;  %v25_v0 = vld [vmem:[#allocation3] sm:$0x1]  ;;  %v26_v1 = vld [vmem:[#allocation3 + $0x1] sm:$0x1]  ;;  %v34_v4 = vstv %s126_s1 }
   0xe   :  { %vm29_vm0 = vcmask 1040384   ;;  %v28_v2 = vmul.f32 %v26_v1, %v25_v0  ;;  %v27_v5 = vld [vmem:[#allocation3 + $0x2] sm:$0x1]  ;;  %s100_s16 = smov [#allocation6]  }
   0xf   :  { %s44_s17 = sshll.u32 %s100_s16, 4  ;;  %s45_s17 = int_to_ptr.vmem [resolvable:$true] %s44_s17 }
  0x10   :  { %v30_v3 = vsel %vm29_vm0, %v28_v2, 0.0  ;;  %s75_s0 = scalar_lea.vmem %s45_s17, 16  ;;  %s79_s18 = scalar_lea.vmem %s45_s17, 32 }
  0x11   :  { %31 = vadd.xlane.f32.xlu0 %v30_v3  ;;  %p76_p5 = scmp.ne.s32.totalorder %s45_s17, %s75_s0  ;;  %p80_p6 = scmp.lt.s32.totalorder %s45_s17, %s45_s17 }
  0x12   :  { %p81_p7 = scmp.lt.s32.totalorder %s79_s18, %s75_s0 }
  0x14   :  { %p82_p8 = por %p81_p7, %p80_p6 }
  0x16   :  { %p83_p9 = pnand %p82_p8, %p76_p5 }
  0x9a   :  { %v32_v6 = vpop.xlane.xlu0 %31 }
  0x9b   :  { %v35_v7 = vadd.f32 %v34_v4, %v32_v6 }
  0x9d   :  { %v36_v8 = vadd.f32 %v35_v7, %v27_v5 }
  0x9f   :  { %37 = vst [vmem:[#allocation6] sm:$0x1] %v36_v8 }
  0xa0   :  { %86 = shalt.err (!%p83_p9)
}
  0xa1   :  { %47 = dma.vmem_to_hbm [thread:$0]  %s45_s17, 16, %s127_s2, [#allocation5]  }
  0xa2   :  { %97 = dma.done.wait [#allocation5], 16  }
  0xa3   :  { %98 = vsyncadd [#allocation5], 4294967280 }
  0xa4   :  { %51 = vsyncpa [#allocation4], 1 }
  0xa5   :  { %52 = vsyncpa [#allocation5], 1 }

</bundles_post_ra>
